<compile_context>
chip_gen: v5e
topology: v5e:2x2
jax: 0.10.0
libtpu: 0.0.40
codegen_flags: <defaults>
</compile_context>

<pallas_src>
import jax
import jax.numpy as jnp
import numpy as np
from jax.experimental import pallas as pl
from jax.experimental.pallas import tpu as pltpu

# ---------------- synthetic small config (mirrors module shapes) -------------
BATCH = 2            # indices.shape[0]
N_CLS = 3            # len(class_names)
N_CTX = 4            # n_ctx (tokens per pooled prompt)
TEXT_PROMPT = 2      # args.text_prompt (prompts selected per sample)
CTX_DIM = 128        # clip_model.ln_final.weight.shape[0]  (lane-dense, %128==0)
POOL = 10            # learnable prompt pool size (text_prompt.shape[0])
SEQ = 16             # tokenized sequence length (CLIP uses 77)
TOTAL_CTX = N_CTX * TEXT_PROMPT
SUF_LEN = SEQ - 1 - TOTAL_CTX       # token_suffix length   (class prompts)
NC_SUF_LEN = SEQ - 1 - N_CTX        # nc_token_suffix length (no-class prompts)
DTYPE = jnp.float32


# --------------------------- class-prompt kernel ------------------------------
def _prompts_kernel(idx_ref, prefix_ref, suffix_ref, pool_ref, prompts_ref):
    # idx_ref    : SMEM (BATCH*TEXT_PROMPT,) int32  (scalar prefetch)
    # prefix_ref : VMEM (N_CLS, 1, CTX_DIM)
    # suffix_ref : VMEM (N_CLS, SUF_LEN, CTX_DIM)
    # pool_ref   : VMEM (POOL, N_CTX, CTX_DIM)      resident learnable pool
    # prompts_ref: VMEM (N_CLS, SEQ, CTX_DIM)       output slab for batch b
    b = pl.program_id(0)
    # Gather the TEXT_PROMPT selected pool rows for this batch element directly
    # from the resident pool (cheap dynamic major-axis reads; no extra DMA).
    ctx_rows = [pool_ref[idx_ref[b * TEXT_PROMPT + t]] for t in range(TEXT_PROMPT)]
    ctx = ctx_rows[0] if TEXT_PROMPT == 1 else jnp.concatenate(ctx_rows, axis=0)
    ctx_b = jnp.broadcast_to(ctx[None, :, :], (N_CLS, TOTAL_CTX, CTX_DIM))
    # Single aligned full-tile store of the whole (N_CLS, SEQ, CTX_DIM) slab.
    prompts_ref[...] = jnp.concatenate(
        [prefix_ref[...], ctx_b, suffix_ref[...]], axis=1)


def _make_prompts_call(batch, single_buffer_constants):
    const_kw = ({"pipeline_mode": pl.Buffered(1)}
                if single_buffer_constants else {})
    const_idx = lambda b, idx: (0, 0, 0)
    grid_spec = pltpu.PrefetchScalarGridSpec(
        num_scalar_prefetch=1,
        grid=(batch,),
        in_specs=[
            pl.BlockSpec((N_CLS, 1, CTX_DIM), const_idx, **const_kw),
            pl.BlockSpec((N_CLS, SUF_LEN, CTX_DIM), const_idx, **const_kw),
            pl.BlockSpec((POOL, N_CTX, CTX_DIM), const_idx, **const_kw),
        ],
        out_specs=pl.BlockSpec((N_CLS, SEQ, CTX_DIM), lambda b, idx: (b, 0, 0)),
    )
    return pl.pallas_call(
        _prompts_kernel,
        grid_spec=grid_spec,
        out_shape=jax.ShapeDtypeStruct((batch * N_CLS, SEQ, CTX_DIM), DTYPE),
        compiler_params=pltpu.CompilerParams(
            # No resident/revisited output block -> batch axis safely "parallel".
            dimension_semantics=("parallel",),
            # Generous at toy shapes; recompute from block sizes at real shapes.
            vmem_limit_bytes=32 * 1024 * 1024,
        ),
    )


# ----------------------- no-class ("only_prefix") kernel ----------------------
def _nc_prompts_kernel(nc_prefix_ref, pool_ref, nc_suffix_ref, nc_ref):
    nc_ref[...] = jnp.concatenate(
        [
            jnp.broadcast_to(nc_prefix_ref[...], (POOL, 1, CTX_DIM)),
            pool_ref[...],
            jnp.broadcast_to(nc_suffix_ref[...], (POOL, NC_SUF_LEN, CTX_DIM)),
        ],
        axis=1,
    )


def _make_nc_call():
    # Grid-less call: whole arrays land in VMEM once (single-buffered by
    # construction), one aligned full-tile store.
    return pl.pallas_call(
        _nc_prompts_kernel,
        out_shape=jax.ShapeDtypeStruct((POOL, SEQ, CTX_DIM), DTYPE),
    )


# ------------------------------ wrapper ---------------------------------------
def prompt_learner_forward(indices, params, infer=False):
    """Mirrors PromptLearner.forward (prompt_pos == 2)."""
    batch = indices.shape[0]
    # Flat 1-D int32 indices for SMEM scalar prefetch; clamp so a bad index can
    # never drive an out-of-range VMEM read (PyTorch gather would raise instead).
    idx_flat = jnp.clip(indices.reshape(-1).astype(jnp.int32), 0, POOL - 1)

    args = (idx_flat, params["token_prefix"], params["token_suffix"],
            params["text_prompt"])
    try:
        prompts = _make_prompts_call(batch, True)(*args)
    except Exception:
        # pipeline_mode=pl.Buffered(1) unsupported on this jax build: fall back
        # to default (double-buffered) constant inputs.
        prompts = _make_prompts_call(batch, False)(*args)

    tokenized = jnp.tile(params["tokenized_prompts"][None, :, :],
                         (batch, 1, 1)).reshape(batch * N_CLS, SEQ)
    if infer:
        return prompts, tokenized

    nc_prompts = _make_nc_call()(
        params["nc_token_prefix"], params["text_prompt"],
        params["nc_token_suffix"])
    nc_tokenized = jnp.tile(params["nc_tokenized_prompts"], (POOL, 1))
    return prompts, tokenized, nc_prompts, nc_tokenized


# ------------------------------ reference ------------------------------------
def reference_forward(indices, p):
    batch = indices.shape[0]
    ctx = p["text_prompt"][indices].reshape(batch, TOTAL_CTX, CTX_DIM)
    prefix = jnp.broadcast_to(p["token_prefix"][None], (batch, N_CLS, 1, CTX_DIM))
    suffix = jnp.broadcast_to(p["token_suffix"][None],
                              (batch, N_CLS, SUF_LEN, CTX_DIM))
    ctx_r = jnp.broadcast_to(ctx[:, None], (batch, N_CLS, TOTAL_CTX, CTX_DIM))
    prompts = jnp.concatenate([prefix, ctx_r, suffix], axis=2)
    prompts = prompts.reshape(batch * N_CLS, SEQ, CTX_DIM)
    nc_prefix = jnp.broadcast_to(p["nc_token_prefix"], (POOL, 1, CTX_DIM))
    nc_suffix = jnp.broadcast_to(p["nc_token_suffix"], (POOL, NC_SUF_LEN, CTX_DIM))
    nc_prompts = jnp.concatenate([nc_prefix, p["text_prompt"], nc_suffix], axis=1)
    return prompts, nc_prompts


# ------------------------------ main ------------------------------------------
if __name__ == "__main__":
    key = jax.random.PRNGKey(0)
    k1, k2, k3, k4, k5 = jax.random.split(key, 5)

    params = {
        # frozen buffers __init__ would produce from CLIP's token embedding
        "token_prefix": jax.random.normal(k1, (N_CLS, 1, CTX_DIM), DTYPE),
        "token_suffix": jax.random.normal(k2, (N_CLS, SUF_LEN, CTX_DIM), DTYPE),
        "nc_token_prefix": jax.random.normal(k3, (1, 1, CTX_DIM), DTYPE),
        "nc_token_suffix": jax.random.normal(k4, (1, NC_SUF_LEN, CTX_DIM), DTYPE),
        # learnable prompt pool
        "text_prompt": jax.random.normal(k5, (POOL, N_CTX, CTX_DIM), DTYPE),
        # synthetic token ids
        "tokenized_prompts": (jnp.arange(N_CLS * SEQ, dtype=jnp.int32)
                              .reshape(N_CLS, SEQ) % 97),
        "nc_tokenized_prompts": (jnp.arange(SEQ, dtype=jnp.int32)
                                 .reshape(1, SEQ) % 97),
    }

    indices = jnp.array([[1, 3], [5, 7]], dtype=jnp.int32)  # (BATCH, TEXT_PROMPT)

    prompts, tokenized, nc_prompts, nc_tokenized = prompt_learner_forward(
        indices, params, infer=False)
    jax.block_until_ready((prompts, tokenized, nc_prompts, nc_tokenized))

    ref_prompts, ref_nc_prompts = reference_forward(indices, params)
    np.testing.assert_allclose(np.asarray(prompts), np.asarray(ref_prompts),
                               rtol=1e-6, atol=1e-6)
    np.testing.assert_allclose(np.asarray(nc_prompts), np.asarray(ref_nc_prompts),
                               rtol=1e-6, atol=1e-6)
    assert tokenized.shape == (BATCH * N_CLS, SEQ)
    assert nc_tokenized.shape == (POOL, SEQ)

    # infer=True path returns only the class prompts + tokenized ids (the nc
    # kernel is not launched at all, matching PyTorch forward(infer=True)).
    prompts_i, tokenized_i = prompt_learner_forward(indices, params, infer=True)
    jax.block_until_ready((prompts_i, tokenized_i))
    np.testing.assert_allclose(np.asarray(prompts_i), np.asarray(ref_prompts),
                               rtol=1e-6, atol=1e-6)

    print("KERNEL_OK")
</pallas_src>

<mosaic_0001>
module attributes {stable_mosaic.version = 11 : i64} {
  func.func @_prompts_kernel(%arg0: i32, %arg1: memref<4xi32, #tpu.memory_space<smem>>, %arg2: memref<3x1x128xf32, #tpu.memory_space<vmem>>, %arg3: memref<3x7x128xf32, #tpu.memory_space<vmem>>, %arg4: memref<10x4x128xf32, #tpu.memory_space<vmem>>, %arg5: memref<3x16x128xf32, #tpu.memory_space<vmem>>) attributes {dimension_semantics = [#tpu.dimension_semantics<parallel>], iteration_bounds = array<i64: 2>, scalar_prefetch = 1 : i64, scratch_operands = 0 : i64, tpu.core_type = #tpu.core_type<tc>, window_params = [{pipeline_mode = #tpu.pipeline_mode<synchronous>, transform_indices = @transform_0, window_bounds = array<i64: 3, 1, 128>}, {pipeline_mode = #tpu.pipeline_mode<synchronous>, transform_indices = @transform_1, window_bounds = array<i64: 3, 7, 128>}, {pipeline_mode = #tpu.pipeline_mode<synchronous>, transform_indices = @transform_2, window_bounds = array<i64: 10, 4, 128>}, {transform_indices = @transform_3, window_bounds = array<i64: 3, 16, 128>}]} {
    %c2_i32 = arith.constant 2 : i32
    %0 = arith.muli %arg0, %c2_i32 : i32
    %c0_i32 = arith.constant 0 : i32
    %1 = arith.addi %0, %c0_i32 : i32
    %2 = arith.index_cast %1 : i32 to index
    %3 = memref.load %arg1[%2] : memref<4xi32, #tpu.memory_space<smem>>
    %4 = arith.index_cast %3 : i32 to index
    %c0 = arith.constant 0 : index
    %c0_0 = arith.constant 0 : index
    %5 = vector.load %arg4[%4, %c0, %c0_0] : memref<10x4x128xf32, #tpu.memory_space<vmem>>, vector<1x4x128xf32>
    %6 = vector.shape_cast %5 : vector<1x4x128xf32> to vector<4x128xf32>
    %c2_i32_1 = arith.constant 2 : i32
    %7 = arith.muli %arg0, %c2_i32_1 : i32
    %c1_i32 = arith.constant 1 : i32
    %8 = arith.addi %7, %c1_i32 : i32
    %9 = arith.index_cast %8 : i32 to index
    %10 = memref.load %arg1[%9] : memref<4xi32, #tpu.memory_space<smem>>
    %11 = arith.index_cast %10 : i32 to index
    %c0_2 = arith.constant 0 : index
    %c0_3 = arith.constant 0 : index
    %12 = vector.load %arg4[%11, %c0_2, %c0_3] : memref<10x4x128xf32, #tpu.memory_space<vmem>>, vector<1x4x128xf32>
    %13 = vector.shape_cast %12 : vector<1x4x128xf32> to vector<4x128xf32>
    %14 = tpu.concatenate %6, %13 in 0 : vector<4x128xf32>, vector<4x128xf32> -> vector<8x128xf32>
    %15 = vector.shape_cast %14 : vector<8x128xf32> to vector<1x8x128xf32>
    %16 = vector.shape_cast %15 : vector<1x8x128xf32> to vector<1x8x128xf32>
    %17 = vector.broadcast %16 : vector<1x8x128xf32> to vector<3x8x128xf32>
    %c0_4 = arith.constant 0 : index
    %c0_5 = arith.constant 0 : index
    %c0_6 = arith.constant 0 : index
    %18 = vector.load %arg2[%c0_4, %c0_5, %c0_6] : memref<3x1x128xf32, #tpu.memory_space<vmem>>, vector<3x1x128xf32>
    %c0_7 = arith.constant 0 : index
    %c0_8 = arith.constant 0 : index
    %c0_9 = arith.constant 0 : index
    %19 = vector.load %arg3[%c0_7, %c0_8, %c0_9] : memref<3x7x128xf32, #tpu.memory_space<vmem>>, vector<3x7x128xf32>
    %20 = tpu.concatenate %18, %17, %19 in 1 : vector<3x1x128xf32>, vector<3x8x128xf32>, vector<3x7x128xf32> -> vector<3x16x128xf32>
    %c0_10 = arith.constant 0 : index
    %c0_11 = arith.constant 0 : index
    %c0_12 = arith.constant 0 : index
    %21 = vector.load %arg5[%c0_10, %c0_11, %c0_12] : memref<3x16x128xf32, #tpu.memory_space<vmem>>, vector<3x16x128xf32>
    tpu.vector_store %arg5[%c0_10, %c0_11, %c0_12], %20 {strides = array<i32>} : memref<3x16x128xf32, #tpu.memory_space<vmem>>, vector<3x16x128xf32>,
    return
  }
  func.func @transform_0(%arg0: i32, %arg1: memref<4xi32, #tpu.memory_space<smem>>) -> (i32, i32, i32) {
    %c0_i32 = arith.constant 0 : i32
    %c0_i32_0 = arith.constant 0 : i32
    %c0_i32_1 = arith.constant 0 : i32
    %c0_i32_2 = arith.constant 0 : i32
    return %c0_i32, %c0_i32_0, %c0_i32_1 : i32, i32, i32
  }
  func.func @transform_1(%arg0: i32, %arg1: memref<4xi32, #tpu.memory_space<smem>>) -> (i32, i32, i32) {
    %c0_i32 = arith.constant 0 : i32
    %c0_i32_0 = arith.constant 0 : i32
    %c0_i32_1 = arith.constant 0 : i32
    %c0_i32_2 = arith.constant 0 : i32
    return %c0_i32, %c0_i32_0, %c0_i32_1 : i32, i32, i32
  }
  func.func @transform_2(%arg0: i32, %arg1: memref<4xi32, #tpu.memory_space<smem>>) -> (i32, i32, i32) {
    %c0_i32 = arith.constant 0 : i32
    %c0_i32_0 = arith.constant 0 : i32
    %c0_i32_1 = arith.constant 0 : i32
    %c0_i32_2 = arith.constant 0 : i32
    return %c0_i32, %c0_i32_0, %c0_i32_1 : i32, i32, i32
  }
  func.func @transform_3(%arg0: i32, %arg1: memref<4xi32, #tpu.memory_space<smem>>) -> (i32, i32, i32) {
    %c0_i32 = arith.constant 0 : i32
    %c0_i32_0 = arith.constant 0 : i32
    %c0_i32_1 = arith.constant 0 : i32
    return %arg0, %c0_i32, %c0_i32_0 : i32, i32, i32
  }
}

module attributes {stable_mosaic.version = 11 : i64} {
  func.func @_prompts_kernel(%arg0: i32, %arg1: memref<4xi32, #tpu.memory_space<smem>>, %arg2: memref<3x1x128xf32, #tpu.memory_space<vmem>>, %arg3: memref<3x7x128xf32, #tpu.memory_space<vmem>>, %arg4: memref<10x4x128xf32, #tpu.memory_space<vmem>>, %arg5: memref<3x16x128xf32, #tpu.memory_space<vmem>>) attributes {dimension_semantics = [#tpu.dimension_semantics<parallel>], iteration_bounds = array<i64: 2>, scalar_prefetch = 1 : i64, scratch_operands = 0 : i64, tpu.core_type = #tpu.core_type<tc>, window_params = [{pipeline_mode = #tpu.pipeline_mode<synchronous>, transform_indices = @transform_0, window_bounds = array<i64: 3, 1, 128>}, {pipeline_mode = #tpu.pipeline_mode<synchronous>, transform_indices = @transform_1, window_bounds = array<i64: 3, 7, 128>}, {pipeline_mode = #tpu.pipeline_mode<synchronous>, transform_indices = @transform_2, window_bounds = array<i64: 10, 4, 128>}, {transform_indices = @transform_3, window_bounds = array<i64: 3, 16, 128>}]} {
    %c2_i32 = arith.constant 2 : i32
    %0 = arith.muli %arg0, %c2_i32 : i32
    %c0_i32 = arith.constant 0 : i32
    %1 = arith.addi %0, %c0_i32 : i32
    %2 = arith.index_cast %1 : i32 to index
    %3 = memref.load %arg1[%2] : memref<4xi32, #tpu.memory_space<smem>>
    %4 = arith.index_cast %3 : i32 to index
    %c0 = arith.constant 0 : index
    %c0_0 = arith.constant 0 : index
    %5 = vector.load %arg4[%4, %c0, %c0_0] : memref<10x4x128xf32, #tpu.memory_space<vmem>>, vector<1x4x128xf32>
    %6 = vector.shape_cast %5 : vector<1x4x128xf32> to vector<4x128xf32>
    %c2_i32_1 = arith.constant 2 : i32
    %7 = arith.muli %arg0, %c2_i32_1 : i32
    %c1_i32 = arith.constant 1 : i32
    %8 = arith.addi %7, %c1_i32 : i32
    %9 = arith.index_cast %8 : i32 to index
    %10 = memref.load %arg1[%9] : memref<4xi32, #tpu.memory_space<smem>>
    %11 = arith.index_cast %10 : i32 to index
    %c0_2 = arith.constant 0 : index
    %c0_3 = arith.constant 0 : index
    %12 = vector.load %arg4[%11, %c0_2, %c0_3] : memref<10x4x128xf32, #tpu.memory_space<vmem>>, vector<1x4x128xf32>
    %13 = vector.shape_cast %12 : vector<1x4x128xf32> to vector<4x128xf32>
    %14 = tpu.concatenate %6, %13 in 0 : vector<4x128xf32>, vector<4x128xf32> -> vector<8x128xf32>
    %15 = vector.shape_cast %14 : vector<8x128xf32> to vector<1x8x128xf32>
    %16 = vector.shape_cast %15 : vector<1x8x128xf32> to vector<1x8x128xf32>
    %17 = vector.broadcast %16 : vector<1x8x128xf32> to vector<3x8x128xf32>
    %c0_4 = arith.constant 0 : index
    %c0_5 = arith.constant 0 : index
    %c0_6 = arith.constant 0 : index
    %18 = vector.load %arg2[%c0_4, %c0_5, %c0_6] : memref<3x1x128xf32, #tpu.memory_space<vmem>>, vector<3x1x128xf32>
    %c0_7 = arith.constant 0 : index
    %c0_8 = arith.constant 0 : index
    %c0_9 = arith.constant 0 : index
    %19 = vector.load %arg3[%c0_7, %c0_8, %c0_9] : memref<3x7x128xf32, #tpu.memory_space<vmem>>, vector<3x7x128xf32>
    %20 = tpu.concatenate %18, %17, %19 in 1 : vector<3x1x128xf32>, vector<3x8x128xf32>, vector<3x7x128xf32> -> vector<3x16x128xf32>
    %c0_10 = arith.constant 0 : index
    %c0_11 = arith.constant 0 : index
    %c0_12 = arith.constant 0 : index
    %21 = vector.load %arg5[%c0_10, %c0_11, %c0_12] : memref<3x16x128xf32, #tpu.memory_space<vmem>>, vector<3x16x128xf32>
    tpu.vector_store %arg5[%c0_10, %c0_11, %c0_12], %20 {strides = array<i32>} : memref<3x16x128xf32, #tpu.memory_space<vmem>>, vector<3x16x128xf32>,
    return
  }
  func.func @transform_0(%arg0: i32, %arg1: memref<4xi32, #tpu.memory_space<smem>>) -> (i32, i32, i32) {
    %c0_i32 = arith.constant 0 : i32
    %c0_i32_0 = arith.constant 0 : i32
    %c0_i32_1 = arith.constant 0 : i32
    %c0_i32_2 = arith.constant 0 : i32
    return %c0_i32, %c0_i32_0, %c0_i32_1 : i32, i32, i32
  }
  func.func @transform_1(%arg0: i32, %arg1: memref<4xi32, #tpu.memory_space<smem>>) -> (i32, i32, i32) {
    %c0_i32 = arith.constant 0 : i32
    %c0_i32_0 = arith.constant 0 : i32
    %c0_i32_1 = arith.constant 0 : i32
    %c0_i32_2 = arith.constant 0 : i32
    return %c0_i32, %c0_i32_0, %c0_i32_1 : i32, i32, i32
  }
  func.func @transform_2(%arg0: i32, %arg1: memref<4xi32, #tpu.memory_space<smem>>) -> (i32, i32, i32) {
    %c0_i32 = arith.constant 0 : i32
    %c0_i32_0 = arith.constant 0 : i32
    %c0_i32_1 = arith.constant 0 : i32
    %c0_i32_2 = arith.constant 0 : i32
    return %c0_i32, %c0_i32_0, %c0_i32_1 : i32, i32, i32
  }
  func.func @transform_3(%arg0: i32, %arg1: memref<4xi32, #tpu.memory_space<smem>>) -> (i32, i32, i32) {
    %c0_i32 = arith.constant 0 : i32
    %c0_i32_0 = arith.constant 0 : i32
    %c0_i32_1 = arith.constant 0 : i32
    return %arg0, %c0_i32, %c0_i32_0 : i32, i32, i32
  }
}

</mosaic_0001>

<bundles_post_ra>
// kernel: tpu_custom_call.1
= control target key start
LH: loop header
LB: loop body
LE: loop exit
PB: predicated region body
PF: predicated region fallthrough
CT: control target
= control target key end

     0   :  { %s632_s18 = smov [#allocation3]   ;;  %s801_s0 = inlined_call_operand.hbm [shape: s32[4], index: 0, kind: input, shape index: {}]   ;;  %s802_s1 = inlined_call_operand.hbm [shape: f32[3,1,128], index: 1, kind: input, shape index: {}]   ;;  %s803_s2 = inlined_call_operand.hbm [shape: f32[3,7,128], index: 2, kind: input, shape index: {}]   ;;  %s804_s3 = inlined_call_operand.hbm [shape: f32[10,4,128], index: 3, kind: input, shape index: {}]   ;;  %s805_s4 = inlined_call_operand.hbm [shape: f32[6,16,128], index: 4, kind: output, shape index: {}]  }
   0x1   :  { %s10_s17 = sshll.u32 %s801_s0, 4  ;;  %s11_s17 = int_to_ptr.hbm [resolvable:$true] %s10_s17 }
   0x2   :  { %13 = dma.hbm_to_smem %s11_s17, 16, %s632_s18, [#allocation2] }
   0x3   :  { %602 = dma.done.wait [#allocation2], 16 }
   0x4   :  { %603 = vsyncadd [#allocation2], 4294967280 }
   0x5   :  { %16 = sfence }
   0x6   :  { %17 = vsyncpa [#allocation5], 0 }
   0x7   :  { %18 = vsyncpa [#allocation8], 0 }
   0x8   :  { %19 = vsyncpa [#allocation6], 0 }
   0x9   :  { %21 = vsyncpa [#allocation6 + $0x1], 0  ;;  %s672_s19 = smov 0   ;;  %s674_s20 = smov 0  }
   0xa   :  { %s676_s21 = smov 0   ;;  %s678_s22 = smov 0  }
   0xb LB: > { %s693_s0 = sadd.s32 4294967295, %s630_s22   ;;  %s357_s23 = sadd.s32 4294967294, %s630_s22   ;;  %s630_s22 = sphi %s678_s22, %s813_s22   ;;  %s626_s21 = sphi %s676_s21, %s812_s21   ;;  %s622_s20 = sphi %s674_s20, %s811_s20   ;;  %s618_s19 = sphi %s672_s19, %s810_s19  }
   0xc   : > { %s697_s24 = sadd.s32 1, %s630_s22   ;;  %s97_s25 = sadd.s32 1, %s626_s21 }
   0xd   : > { %s94_s26 = ssub.s32 %s630_s22, %s697_s24  ;;  %p107_p0 = scmp.ne.s32.totalorder %s626_s21, %s622_s20 }
   0xe   : > { %p95_p1 = scmp.eq.s32.totalorder %s94_s26, 0  ;;  %p108_p2 = scmp.eq.s32.totalorder %s693_s0, 1 }
   0xf   : > { %p113_p3 = scmp.ne.s32.totalorder %s622_s20, %s618_s19  ;;  %p114_p4 = scmp.eq.s32.totalorder %s357_s23, 1 }
  0x10   : > { %s708_s27 = scalar_select %p95_p1, %s626_s21, %s97_s25  }
  0x11   : > { %p710_p5 = por %p108_p2, %p107_p0  ;;  %p714_p6 = por %p114_p4, %p113_p3 }
  0x12   : > { %p358_p7 = scmp.ge.s32.totalorder %s630_s22, 1  ;;  %p121_p8 = scmp.lt.s32.totalorder %s630_s22, 3 }
  0x13   : > { %p405_p9 = scmp.eq.s32.totalorder %s693_s0, 0  ;;  %s146_s7 = sshll.u32 %s803_s2, 4  ;;  %s147_s7 = int_to_ptr.hbm [resolvable:$true] %s146_s7 }
  0x14   : > { %p721_p10 = pnand %p358_p7, %p121_p8  ;;  %s633_s8 = smov [#allocation7]  }
  0x15   : > { %s148_s9 = sshll.u32 %s633_s8, 4  ;;  %s132_s13 = sshll.u32 %s802_s1, 4  ;;  %s149_s9 = int_to_ptr.vmem [resolvable:$true] %s148_s9  ;;  %s133_s13 = int_to_ptr.hbm [resolvable:$true] %s132_s13 }
  0x16   : > { %p391_p11 = pneg %p721_p10  ;;  %s634_s14 = smov 128  }
  0x17   : > { %s635_s15 = smov 8   ;;  %s636_s16 = smov [#allocation4]  }
  0x18   : > { %p732_p12 = pnand %p405_p9, %p391_p11  ;;  %s134_s17 = sshll.u32 %s636_s16, 4  ;;  %s135_s17 = int_to_ptr.vmem [resolvable:$true] %s134_s17 }
  0x19   : > { %s637_s18 = smov 16   ;;  %s638_s23 = smov 1  }
  0x1a   : > { %397 = dma.hbm_to_vmem [thread:$0]  (!%p732_p12), %s147_s7, 384, %s149_s9, [#allocation8], %s634_s14, %s634_s14, %s635_s15  }
  0x1b   : > { %394 = dma.hbm_to_vmem [thread:$0]  (!%p732_p12), %s133_s13, 48, %s135_s17, [#allocation5], %s637_s18, %s637_s18, %s638_s23  }
  0x1c   : > { %s160_s5 = sshll.u32 %s804_s3, 4  ;;  %s639_s6 = smov [#allocation9]   ;;  %s161_s5 = int_to_ptr.hbm [resolvable:$true] %s160_s5 }
  0x1d   : > { %s162_s8 = sshll.u32 %s639_s6, 4  ;;  %s640_s11 = smov 64   ;;  %s163_s8 = int_to_ptr.vmem [resolvable:$true] %s162_s8 }
  0x1e   : > { %s641_s12 = smov 4   ;;  %178 = sbr.rel (%p721_p10) target bundleno = 64 (0x40), region = 32 }
  0x1f   : > { %400 = dma.hbm_to_vmem [thread:$0]  (!%p732_p12), %s161_s5, 640, %s163_s8, [#allocation8], %s640_s11, %s640_s11, %s641_s12  }
  0x23   : > { %605 = dma.done.wait (%p405_p9), [#allocation5], 48  }
  0x24   : > { %607 = vsyncadd (%p405_p9), [#allocation5], 4294967248 }
  0x25   : > { %609 = dma.done.wait (%p405_p9), [#allocation8], 1024  }
  0x26   : > { %611 = vsyncadd (%p405_p9), [#allocation8], 4294966272  ;;  %s366_s7 = sshll.u32 %s693_s0, 1  ;;  %s205_s13 = sand.u32 1, %s622_s20   ;;  %vm222_vm0 = vcmask 1043456   ;;  %vm242_vm1 = vcmask 1040384  }
  0x27   : > { %s210_s9 = sld [smem:[#allocation3 + %s366_s7]]  ;;  %s214_s30 = sadd.s32 1, %s366_s7  ;;  %v227_v0 = vld [vmem:[#allocation7] sm:$0x7f]  ;;  %v228_v3 = vld [vmem:[#allocation7 + $0x8] sm:$0x7f] }
  0x28   : > { %s215_s10 = sld [smem:[#allocation3 + %s214_s30]]  ;;  %s376_s15 = smul.u32 48, %s205_s13  ;;  %v236_v5 = vrot.slane %v227_v0, 7  ;;  %v229_v6 = vld [vmem:[#allocation7 + $0x10] sm:$0x7f]  ;;  %v237_v10 = vrot.slane %v228_v3, 7 }
  0x29   : > { %s375_s17 = smul.u32 48, %s693_s0  ;;  %v224_v8 = vld [vmem:[#allocation4] sm:$0x1]  ;;  %v225_v9 = vld [vmem:[#allocation4 + $0x1] sm:$0x1]  ;;  %v238_v13 = vrot.slane %v229_v6, 7 }
  0x2a   : > { %v226_v12 = vld [vmem:[#allocation4 + $0x2] sm:$0x1]  ;;  %s207_s0 = scalar_lea.vmem [#allocation10], %s376_s15  ;;  %s256_s11 = scalar_lea.sflag [#allocation6], %s205_s13 }
  0x2b   : > { %s268_s5 = scalar_lea.hbm %s805_s4, %s375_s17  ;;  %s269_s6 = sshll.u32 %s207_s0, 4  ;;  %s270_s6 = int_to_ptr.vmem [resolvable:$true] %s269_s6 }
  0x2c   : > { %s271_s8 = sshll.u32 %s268_s5, 4  ;;  %s272_s8 = int_to_ptr.hbm [resolvable:$true] %s271_s8 }
  0x2d   : > { %s367_s14 = sshll.u32 %s210_s9, 2  ;;  %s572_s12 = sshra.s32 %s272_s8, 4  ;;  %s573_s12 = int_to_ptr.hbm [resolvable:$true] %s572_s12 }
  0x2e   : > { %s368_s16 = sshll.u32 %s215_s10, 2  ;;  %s212_s18 = scalar_lea.vmem [#allocation9], %s367_s14 }
  0x2f   : > { %v213_v1 = vld [vmem:[%s212_s18] sm:$0xf]  ;;  %s217_s23 = scalar_lea.vmem [#allocation9], %s368_s16  ;;  %s574_s7 = scalar_lea.hbm %s573_s12, 48 }
  0x30   : > { %v218_v2 = vld [vmem:[%s217_s23] sm:$0xf]  ;;  %p575_p13 = scmp.ne.s32.totalorder %s573_s12, %s574_s7  ;;  %s578_s10 = scalar_lea.hbm %s805_s4, 96 }
  0x31   : > { %v220_v4 = vrot.slane %v218_v2, 4  ;;  %p579_p2 = scmp.lt.s32.totalorder %s573_s12, %s805_s4  ;;  %p580_p3 = scmp.lt.s32.totalorder %s578_s10, %s574_s7 }
  0x32   : > { %p576_p0 = pnand %p575_p13, %p710_p5 }
  0x33   : > { %v223_v7 = vsel %vm222_vm0, %v213_v1, %v220_v4  ;;  %p581_p4 = por %p580_p3, %p579_p2 }
  0x34   : > { %v231_v11 = vrot.slane %v223_v7, 7  ;;  %p577_p1 = pneg %p576_p0 }
  0x36   : > { %v243_v14 = vsel %vm242_vm1, %v224_v8, %v231_v11  ;;  %v246_v15 = vsel %vm242_vm1, %v231_v11, %v236_v5  ;;  %v244_v16 = vsel %vm242_vm1, %v225_v9, %v231_v11  ;;  %v247_v17 = vsel %vm242_vm1, %v231_v11, %v237_v10  ;;  %p582_p7 = pnand %p581_p4, %p577_p1 }
  0x37   : > { %249 = vst [vmem:[%s207_s0] sm:$0xff] %v243_v14  ;;  %v245_v18 = vsel %vm242_vm1, %v226_v12, %v231_v11  ;;  %v248_v19 = vsel %vm242_vm1, %v231_v11, %v238_v13 }
  0x38   : > { %250 = vst [vmem:[%s207_s0 + $0x8] sm:$0xff] %v246_v15 }
  0x39   : > { %251 = vst [vmem:[%s207_s0 + $0x10] sm:$0xff] %v244_v16 }
  0x3a   : > { %252 = vst [vmem:[%s207_s0 + $0x18] sm:$0xff] %v247_v17 }
  0x3b   : > { %253 = vst [vmem:[%s207_s0 + $0x20] sm:$0xff] %v245_v18 }
  0x3c   : > { %254 = vst [vmem:[%s207_s0 + $0x28] sm:$0xff] %v248_v19 }
  0x3d   : > { %585 = shalt.err (!%p582_p7)
}
  0x3e   : > { %s642_s13 = smov 128   ;;  %s643_s16 = smov 8  }
  0x3f   : > { %389 = dma.vmem_to_hbm [thread:$0]  (%p710_p5), %s270_s6, 768, %s272_s8, %s256_s11, %s642_s13, %s642_s13, %s643_s16  }
  0x40 PF: > { %p411_p8 = scmp.ge.s32.totalorder %s630_s22, 2  ;;  %s286_s17 = sand.u32 1, %s618_s19  }
  0x41   : > { %s287_s18 = scalar_lea.sflag [#allocation6], %s286_s17 }
  0x42   : > { %p402_p9 = pnand %p411_p8, %p714_p6 }
  0x44   : > { %p403_p10 = pneg %p402_p9 }
  0x46   : > { %613 = dma.done.wait (%p403_p10), %s287_s18, 768  }
  0x47   : > { %615 = vsyncadd (%p403_p10), %s287_s18, 4294966528  ;;  %p24_p11 = scmp.ge.s32.totalorder %s697_s24, 4   ;;  %s810_s19 = smov %s622_s20 }
  0x48   : > { %s811_s20 = smov %s626_s21  ;;  %s812_s21 = smov %s708_s27 }
  0x49   : > { %s813_s22 = smov %s697_s24  ;;  %26 = sbr.rel (!%p24_p11) target bundleno = 11 (0xb), region = 79 }
  0x4e   :  { %293 = vsyncpa [#allocation5], 1 }
  0x4f   :  { %295 = vsyncpa [#allocation5 + $0x1], 1 }
  0x50   :  { %296 = vsyncpa [#allocation8], 1 }
  0x51   :  { %297 = vsyncpa [#allocation6], 1 }
  0x52   :  { %299 = vsyncpa [#allocation6 + $0x1], 1 }

// kernel: tpu_custom_call.1
= control target key start
LH: loop header
LB: loop body
LE: loop exit
PB: predicated region body
PF: predicated region fallthrough
CT: control target
= control target key end

     0   :  { %s632_s18 = smov [#allocation3]   ;;  %s801_s0 = inlined_call_operand.hbm [shape: s32[4], index: 0, kind: input, shape index: {}]   ;;  %s802_s1 = inlined_call_operand.hbm [shape: f32[3,1,128], index: 1, kind: input, shape index: {}]   ;;  %s803_s2 = inlined_call_operand.hbm [shape: f32[3,7,128], index: 2, kind: input, shape index: {}]   ;;  %s804_s3 = inlined_call_operand.hbm [shape: f32[10,4,128], index: 3, kind: input, shape index: {}]   ;;  %s805_s4 = inlined_call_operand.hbm [shape: f32[6,16,128], index: 4, kind: output, shape index: {}]  }
   0x1   :  { %s10_s17 = sshll.u32 %s801_s0, 4  ;;  %s11_s17 = int_to_ptr.hbm [resolvable:$true] %s10_s17 }
   0x2   :  { %13 = dma.hbm_to_smem %s11_s17, 16, %s632_s18, [#allocation2] }
   0x3   :  { %602 = dma.done.wait [#allocation2], 16 }
   0x4   :  { %603 = vsyncadd [#allocation2], 4294967280 }
   0x5   :  { %16 = sfence }
   0x6   :  { %17 = vsyncpa [#allocation5], 0 }
   0x7   :  { %18 = vsyncpa [#allocation8], 0 }
   0x8   :  { %19 = vsyncpa [#allocation6], 0 }
   0x9   :  { %21 = vsyncpa [#allocation6 + $0x1], 0  ;;  %s672_s19 = smov 0   ;;  %s674_s20 = smov 0  }
   0xa   :  { %s676_s21 = smov 0   ;;  %s678_s22 = smov 0  }
   0xb LB: > { %s693_s0 = sadd.s32 4294967295, %s630_s22   ;;  %s357_s23 = sadd.s32 4294967294, %s630_s22   ;;  %s630_s22 = sphi %s678_s22, %s813_s22   ;;  %s626_s21 = sphi %s676_s21, %s812_s21   ;;  %s622_s20 = sphi %s674_s20, %s811_s20   ;;  %s618_s19 = sphi %s672_s19, %s810_s19  }
   0xc   : > { %s697_s24 = sadd.s32 1, %s630_s22   ;;  %s97_s25 = sadd.s32 1, %s626_s21 }
   0xd   : > { %s94_s26 = ssub.s32 %s630_s22, %s697_s24  ;;  %p107_p0 = scmp.ne.s32.totalorder %s626_s21, %s622_s20 }
   0xe   : > { %p95_p1 = scmp.eq.s32.totalorder %s94_s26, 0  ;;  %p108_p2 = scmp.eq.s32.totalorder %s693_s0, 1 }
   0xf   : > { %p113_p3 = scmp.ne.s32.totalorder %s622_s20, %s618_s19  ;;  %p114_p4 = scmp.eq.s32.totalorder %s357_s23, 1 }
  0x10   : > { %s708_s27 = scalar_select %p95_p1, %s626_s21, %s97_s25  }
  0x11   : > { %p710_p5 = por %p108_p2, %p107_p0  ;;  %p714_p6 = por %p114_p4, %p113_p3 }
  0x12   : > { %p358_p7 = scmp.ge.s32.totalorder %s630_s22, 1  ;;  %p121_p8 = scmp.lt.s32.totalorder %s630_s22, 3 }
  0x13   : > { %p405_p9 = scmp.eq.s32.totalorder %s693_s0, 0  ;;  %s146_s7 = sshll.u32 %s803_s2, 4  ;;  %s147_s7 = int_to_ptr.hbm [resolvable:$true] %s146_s7 }
  0x14   : > { %p721_p10 = pnand %p358_p7, %p121_p8  ;;  %s633_s8 = smov [#allocation7]  }
  0x15   : > { %s148_s9 = sshll.u32 %s633_s8, 4  ;;  %s132_s13 = sshll.u32 %s802_s1, 4  ;;  %s149_s9 = int_to_ptr.vmem [resolvable:$true] %s148_s9  ;;  %s133_s13 = int_to_ptr.hbm [resolvable:$true] %s132_s13 }
  0x16   : > { %p391_p11 = pneg %p721_p10  ;;  %s634_s14 = smov 128  }
  0x17   : > { %s635_s15 = smov 8   ;;  %s636_s16 = smov [#allocation4]  }
  0x18   : > { %p732_p12 = pnand %p405_p9, %p391_p11  ;;  %s134_s17 = sshll.u32 %s636_s16, 4  ;;  %s135_s17 = int_to_ptr.vmem [resolvable:$true] %s134_s17 }
  0x19   : > { %s637_s18 = smov 16   ;;  %s638_s23 = smov 1  }
  0x1a   : > { %397 = dma.hbm_to_vmem [thread:$0]  (!%p732_p12), %s147_s7, 384, %s149_s9, [#allocation8], %s634_s14, %s634_s14, %s635_s15  }
  0x1b   : > { %394 = dma.hbm_to_vmem [thread:$0]  (!%p732_p12), %s133_s13, 48, %s135_s17, [#allocation5], %s637_s18, %s637_s18, %s638_s23  }
  0x1c   : > { %s160_s5 = sshll.u32 %s804_s3, 4  ;;  %s639_s6 = smov [#allocation9]   ;;  %s161_s5 = int_to_ptr.hbm [resolvable:$true] %s160_s5 }
  0x1d   : > { %s162_s8 = sshll.u32 %s639_s6, 4  ;;  %s640_s11 = smov 64   ;;  %s163_s8 = int_to_ptr.vmem [resolvable:$true] %s162_s8 }
  0x1e   : > { %s641_s12 = smov 4   ;;  %178 = sbr.rel (%p721_p10) target bundleno = 64 (0x40), region = 32 }
  0x1f   : > { %400 = dma.hbm_to_vmem [thread:$0]  (!%p732_p12), %s161_s5, 640, %s163_s8, [#allocation8], %s640_s11, %s640_s11, %s641_s12  }
  0x23   : > { %605 = dma.done.wait (%p405_p9), [#allocation5], 48  }
  0x24   : > { %607 = vsyncadd (%p405_p9), [#allocation5], 4294967248 }
  0x25   : > { %609 = dma.done.wait (%p405_p9), [#allocation8], 1024  }
  0x26   : > { %611 = vsyncadd (%p405_p9), [#allocation8], 4294966272  ;;  %s366_s7 = sshll.u32 %s693_s0, 1  ;;  %s205_s13 = sand.u32 1, %s622_s20   ;;  %vm222_vm0 = vcmask 1043456   ;;  %vm242_vm1 = vcmask 1040384  }
  0x27   : > { %s210_s9 = sld [smem:[#allocation3 + %s366_s7]]  ;;  %s214_s30 = sadd.s32 1, %s366_s7  ;;  %v227_v0 = vld [vmem:[#allocation7] sm:$0x7f]  ;;  %v228_v3 = vld [vmem:[#allocation7 + $0x8] sm:$0x7f] }
  0x28   : > { %s215_s10 = sld [smem:[#allocation3 + %s214_s30]]  ;;  %s376_s15 = smul.u32 48, %s205_s13  ;;  %v236_v5 = vrot.slane %v227_v0, 7  ;;  %v229_v6 = vld [vmem:[#allocation7 + $0x10] sm:$0x7f]  ;;  %v237_v10 = vrot.slane %v228_v3, 7 }
  0x29   : > { %s375_s17 = smul.u32 48, %s693_s0  ;;  %v224_v8 = vld [vmem:[#allocation4] sm:$0x1]  ;;  %v225_v9 = vld [vmem:[#allocation4 + $0x1] sm:$0x1]  ;;  %v238_v13 = vrot.slane %v229_v6, 7 }
  0x2a   : > { %v226_v12 = vld [vmem:[#allocation4 + $0x2] sm:$0x1]  ;;  %s207_s0 = scalar_lea.vmem [#allocation10], %s376_s15  ;;  %s256_s11 = scalar_lea.sflag [#allocation6], %s205_s13 }
  0x2b   : > { %s268_s5 = scalar_lea.hbm %s805_s4, %s375_s17  ;;  %s269_s6 = sshll.u32 %s207_s0, 4  ;;  %s270_s6 = int_to_ptr.vmem [resolvable:$true] %s269_s6 }
  0x2c   : > { %s271_s8 = sshll.u32 %s268_s5, 4  ;;  %s272_s8 = int_to_ptr.hbm [resolvable:$true] %s271_s8 }
  0x2d   : > { %s367_s14 = sshll.u32 %s210_s9, 2  ;;  %s572_s12 = sshra.s32 %s272_s8, 4  ;;  %s573_s12 = int_to_ptr.hbm [resolvable:$true] %s572_s12 }
  0x2e   : > { %s368_s16 = sshll.u32 %s215_s10, 2  ;;  %s212_s18 = scalar_lea.vmem [#allocation9], %s367_s14 }
  0x2f   : > { %v213_v1 = vld [vmem:[%s212_s18] sm:$0xf]  ;;  %s217_s23 = scalar_lea.vmem [#allocation9], %s368_s16  ;;  %s574_s7 = scalar_lea.hbm %s573_s12, 48 }
  0x30   : > { %v218_v2 = vld [vmem:[%s217_s23] sm:$0xf]  ;;  %p575_p13 = scmp.ne.s32.totalorder %s573_s12, %s574_s7  ;;  %s578_s10 = scalar_lea.hbm %s805_s4, 96 }
  0x31   : > { %v220_v4 = vrot.slane %v218_v2, 4  ;;  %p579_p2 = scmp.lt.s32.totalorder %s573_s12, %s805_s4  ;;  %p580_p3 = scmp.lt.s32.totalorder %s578_s10, %s574_s7 }
  0x32   : > { %p576_p0 = pnand %p575_p13, %p710_p5 }
  0x33   : > { %v223_v7 = vsel %vm222_vm0, %v213_v1, %v220_v4  ;;  %p581_p4 = por %p580_p3, %p579_p2 }
  0x34   : > { %v231_v11 = vrot.slane %v223_v7, 7  ;;  %p577_p1 = pneg %p576_p0 }
  0x36   : > { %v243_v14 = vsel %vm242_vm1, %v224_v8, %v231_v11  ;;  %v246_v15 = vsel %vm242_vm1, %v231_v11, %v236_v5  ;;  %v244_v16 = vsel %vm242_vm1, %v225_v9, %v231_v11  ;;  %v247_v17 = vsel %vm242_vm1, %v231_v11, %v237_v10  ;;  %p582_p7 = pnand %p581_p4, %p577_p1 }
  0x37   : > { %249 = vst [vmem:[%s207_s0] sm:$0xff] %v243_v14  ;;  %v245_v18 = vsel %vm242_vm1, %v226_v12, %v231_v11  ;;  %v248_v19 = vsel %vm242_vm1, %v231_v11, %v238_v13 }
  0x38   : > { %250 = vst [vmem:[%s207_s0 + $0x8] sm:$0xff] %v246_v15 }
  0x39   : > { %251 = vst [vmem:[%s207_s0 + $0x10] sm:$0xff] %v244_v16 }
  0x3a   : > { %252 = vst [vmem:[%s207_s0 + $0x18] sm:$0xff] %v247_v17 }
  0x3b   : > { %253 = vst [vmem:[%s207_s0 + $0x20] sm:$0xff] %v245_v18 }
  0x3c   : > { %254 = vst [vmem:[%s207_s0 + $0x28] sm:$0xff] %v248_v19 }
  0x3d   : > { %585 = shalt.err (!%p582_p7)
}
  0x3e   : > { %s642_s13 = smov 128   ;;  %s643_s16 = smov 8  }
  0x3f   : > { %389 = dma.vmem_to_hbm [thread:$0]  (%p710_p5), %s270_s6, 768, %s272_s8, %s256_s11, %s642_s13, %s642_s13, %s643_s16  }
  0x40 PF: > { %p411_p8 = scmp.ge.s32.totalorder %s630_s22, 2  ;;  %s286_s17 = sand.u32 1, %s618_s19  }
  0x41   : > { %s287_s18 = scalar_lea.sflag [#allocation6], %s286_s17 }
  0x42   : > { %p402_p9 = pnand %p411_p8, %p714_p6 }
  0x44   : > { %p403_p10 = pneg %p402_p9 }
  0x46   : > { %613 = dma.done.wait (%p403_p10), %s287_s18, 768  }
  0x47   : > { %615 = vsyncadd (%p403_p10), %s287_s18, 4294966528  ;;  %p24_p11 = scmp.ge.s32.totalorder %s697_s24, 4   ;;  %s810_s19 = smov %s622_s20 }
  0x48   : > { %s811_s20 = smov %s626_s21  ;;  %s812_s21 = smov %s708_s27 }
  0x49   : > { %s813_s22 = smov %s697_s24  ;;  %26 = sbr.rel (!%p24_p11) target bundleno = 11 (0xb), region = 79 }
  0x4e   :  { %293 = vsyncpa [#allocation5], 1 }
  0x4f   :  { %295 = vsyncpa [#allocation5 + $0x1], 1 }
  0x50   :  { %296 = vsyncpa [#allocation8], 1 }
  0x51   :  { %297 = vsyncpa [#allocation6], 1 }
  0x52   :  { %299 = vsyncpa [#allocation6 + $0x1], 1 }

</bundles_post_ra>
